<compile_context>
chip_gen: v5e
topology: v5e:2x2
jax: 0.10.0
libtpu: 0.0.40
codegen_flags: <defaults>
</compile_context>

<pallas_src>
import jax
import jax.numpy as jnp
from jax.experimental import pallas as pl
from jax.experimental.pallas import tpu as pltpu


def _yolo_loss_kernel(pred_ref, targ_ref, sums_ref, acc_ref):
    # pred_ref / targ_ref: VMEM refs of shape [8, T_HW] (channels 0..7 only).
    # sums_ref: SMEM (5,) f32 output. acc_ref: VMEM (8, T_HW) f32 accumulator.
    b = pl.program_id(0)
    h = pl.program_id(1)
    is_first = jnp.logical_and(b == 0, h == 0)
    is_last = jnp.logical_and(b == pl.num_programs(0) - 1,
                              h == pl.num_programs(1) - 1)

    @pl.when(is_first)
    def _():
        acc_ref[...] = jnp.zeros_like(acc_ref)

    pred = pred_ref[...].astype(jnp.float32)   # (8, T_HW)
    targ = targ_ref[...].astype(jnp.float32)

    # ---- box MSE partials (channels 0:4) ----
    diff = targ[0:4, :] - pred[0:4, :]
    acc_ref[0:4, :] += diff * diff

    # ---- objectness BCE-with-logits (channel 4) ----
    obj_p = pred[4:5, :]                       # logits      (1, T_HW)
    obj_t = targ[4:5, :]                       # targets     (1, T_HW)
    obj_mask = (obj_t == 1.0).astype(jnp.float32)
    noobj_mask = (obj_t == 0.0).astype(jnp.float32)

    # numerically-stable BCE with logits: max(x,0) - x*y + log1p(exp(-|x|))
    bce = (jnp.maximum(obj_p, 0.0)
           - obj_p * obj_t
           + jnp.log1p(jnp.exp(-jnp.abs(obj_p))))

    acc_ref[4:5, :] += bce * obj_mask          # obj  BCE partial sum
    acc_ref[5:6, :] += obj_mask                # obj  count
    acc_ref[6:7, :] += bce * noobj_mask        # noobj BCE partial sum
    acc_ref[7:8, :] += noobj_mask              # noobj count

    # Single cross-lane collapse at the very end.
    @pl.when(is_last)
    def _():
        acc = acc_ref[...]
        sums_ref[0] = jnp.sum(acc[0:4, :])     # box squared-error sum
        sums_ref[1] = jnp.sum(acc[4:5, :])     # obj BCE sum
        sums_ref[2] = jnp.sum(acc[5:6, :])     # obj count
        sums_ref[3] = jnp.sum(acc[6:7, :])     # noobj BCE sum
        sums_ref[4] = jnp.sum(acc[7:8, :])     # noobj count


def _pick_hw_tile(hw, cap=2048):
    """Largest multiple of 128 that divides hw and is <= cap, else full hw."""
    if hw <= cap:
        return hw
    t = cap - (cap % 128)
    while t >= 128:
        if hw % t == 0:
            return t
        t -= 128
    return hw   # fallback: full extent (valid BlockSpec even if not %128)


def yolo_loss(predictions, target):
    """predictions, target: arrays of shape [B, C, H, W] (NCHW), C >= 5."""
    B, C, H, W = predictions.shape
    assert target.shape == predictions.shape and C >= 5
    HW = H * W

    pred2 = predictions.reshape(B, C, HW)      # keep native dtype on the wire
    targ2 = target.reshape(B, C, HW)

    # Only channels 0..7 are DMA'd (box 0:4 + objectness 4); pad if C < 8 so the
    # 8-sublane channel block exists. Padding never touches channels 0..4.
    if C < 8:
        pad = ((0, 0), (0, 8 - C), (0, 0))
        pred2 = jnp.pad(pred2, pad)
        targ2 = jnp.pad(targ2, pad)

    T_HW = _pick_hw_tile(HW)
    n_hw = HW // T_HW

    grid_spec = pltpu.PrefetchScalarGridSpec(
        num_scalar_prefetch=0,
        grid=(B, n_hw),
        in_specs=[
            pl.BlockSpec((None, 8, T_HW), lambda b, h: (b, 0, h)),
            pl.BlockSpec((None, 8, T_HW), lambda b, h: (b, 0, h)),
        ],
        out_specs=pl.BlockSpec((5,), lambda b, h: (0,),
                               memory_space=pltpu.MemorySpace.SMEM),
        scratch_shapes=[pltpu.VMEM((8, T_HW), jnp.float32)],
    )

    itemsize = jnp.dtype(predictions.dtype).itemsize
    cost = pl.CostEstimate(
        flops=int(14 * B * HW + 3 * B * 4 * HW),
        transcendentals=int(2 * B * HW),
        bytes_accessed=int(2 * B * 8 * HW * itemsize),
    )

    sums = pl.pallas_call(
        _yolo_loss_kernel,
        out_shape=jax.ShapeDtypeStruct((5,), jnp.float32),
        grid_spec=grid_spec,
        compiler_params=pltpu.CompilerParams(
            dimension_semantics=("arbitrary", "arbitrary")),
        cost_estimate=cost,
    )(pred2, targ2)

    box_loss = sums[0] / jnp.float32(B * 4 * HW)   # MSE mean over all box elems
    object_loss = sums[1] / sums[2]                # mean over obj-selected elems
    no_object_loss = sums[3] / sums[4]             # mean over noobj-selected elems

    lambda_box = lambda_obj = lambda_noobj = 1.0
    return (lambda_box * box_loss,
            lambda_obj * object_loss,
            lambda_noobj * no_object_loss)


def _reference(predictions, target):
    """Pure-JAX reference mirroring the PyTorch module."""
    obj_t = target[:, 4, :, :].astype(jnp.float32)
    obj_p = predictions[:, 4, :, :].astype(jnp.float32)
    obj = obj_t == 1.0
    noobj = obj_t == 0.0

    bce = (jnp.maximum(obj_p, 0.0)
           - obj_p * obj_t
           + jnp.log1p(jnp.exp(-jnp.abs(obj_p))))

    object_loss = jnp.sum(jnp.where(obj, bce, 0.0)) / jnp.sum(obj)
    no_object_loss = jnp.sum(jnp.where(noobj, bce, 0.0)) / jnp.sum(noobj)
    box_loss = jnp.mean(
        (target[:, 0:4].astype(jnp.float32)
         - predictions[:, 0:4].astype(jnp.float32)) ** 2)
    return box_loss, object_loss, no_object_loss


if __name__ == "__main__":
    key = jax.random.PRNGKey(0)
    k_pred, k_box, k_objmask, k_cls = jax.random.split(key, 4)

    B, C, H, W = 2, 8, 16, 16   # channels: 4 box + 1 objectness + 3 class logits

    predictions = jax.random.normal(k_pred, (B, C, H, W), dtype=jnp.float32)

    boxes = jax.random.uniform(k_box, (B, 4, H, W), dtype=jnp.float32)
    # objectness target is exactly 0.0 or 1.0 (both classes present)
    obj_chan = (jax.random.uniform(k_objmask, (B, 1, H, W)) > 0.7).astype(jnp.float32)
    cls_chans = jax.random.normal(k_cls, (B, C - 5, H, W), dtype=jnp.float32)
    target = jnp.concatenate([boxes, obj_chan, cls_chans], axis=1)

    out = yolo_loss(predictions, target)
    out = jax.block_until_ready(out)

    ref = _reference(predictions, target)
    for got, want in zip(out, ref):
        assert jnp.allclose(got, want, rtol=1e-5, atol=1e-5), (got, want)

    print("KERNEL_OK")
</pallas_src>

<mosaic_0001>
module attributes {stable_mosaic.version = 11 : i64} {
  func.func @_yolo_loss_kernel(%arg0: i32, %arg1: i32, %arg2: memref<1x8x256xf32, #tpu.memory_space<vmem>>, %arg3: memref<1x8x256xf32, #tpu.memory_space<vmem>>, %arg4: memref<5xf32, #tpu.memory_space<smem>>, %arg5: memref<8x256xf32, #tpu.memory_space<vmem>>) attributes {dimension_semantics = [#tpu.dimension_semantics<arbitrary>, #tpu.dimension_semantics<arbitrary>], iteration_bounds = array<i64: 2, 1>, scalar_prefetch = 0 : i64, scratch_operands = 1 : i64, tpu.core_type = #tpu.core_type<tc>, window_params = [{transform_indices = @transform_0, window_bounds = array<i64: 1, 8, 256>}, {transform_indices = @transform_1, window_bounds = array<i64: 1, 8, 256>}, {transform_indices = @transform_2, window_bounds = array<i64: 5>}]} {
    %c0_i32 = arith.constant 0 : i32
    %0 = arith.cmpi eq, %arg0, %c0_i32 : i32
    %c0_i32_0 = arith.constant 0 : i32
    %1 = arith.cmpi eq, %arg1, %c0_i32_0 : i32
    %2 = arith.andi %0, %1 : i1
    %c1_i32 = arith.constant 1 : i32
    %3 = arith.cmpi eq, %arg0, %c1_i32 : i32
    %c0_i32_1 = arith.constant 0 : i32
    %4 = arith.cmpi eq, %arg1, %c0_i32_1 : i32
    %5 = arith.andi %3, %4 : i1
    %6 = arith.extui %2 : i1 to i32
    %c0_i32_2 = arith.constant 0 : i32
    %7 = arith.cmpi ne, %6, %c0_i32_2 : i32
    scf.if %7 {
      %cst_28 = arith.constant 0.000000e+00 : f32
      %55 = vector.broadcast %cst_28 : f32 to vector<8x256xf32>
      %c0_29 = arith.constant 0 : index
      %c0_30 = arith.constant 0 : index
      %56 = vector.load %arg5[%c0_29, %c0_30] : memref<8x256xf32, #tpu.memory_space<vmem>>, vector<8x256xf32>
      tpu.vector_store %arg5[%c0_29, %c0_30], %55 {strides = array<i32>} : memref<8x256xf32, #tpu.memory_space<vmem>>, vector<8x256xf32>,
    } else {
    }
    %c0 = arith.constant 0 : index
    %c0_3 = arith.constant 0 : index
    %c0_4 = arith.constant 0 : index
    %8 = vector.load %arg2[%c0, %c0_3, %c0_4] : memref<1x8x256xf32, #tpu.memory_space<vmem>>, vector<1x8x256xf32>
    %9 = vector.shape_cast %8 : vector<1x8x256xf32> to vector<8x256xf32>
    %c0_5 = arith.constant 0 : index
    %c0_6 = arith.constant 0 : index
    %c0_7 = arith.constant 0 : index
    %10 = vector.load %arg3[%c0_5, %c0_6, %c0_7] : memref<1x8x256xf32, #tpu.memory_space<vmem>>, vector<1x8x256xf32>
    %11 = vector.shape_cast %10 : vector<1x8x256xf32> to vector<8x256xf32>
    %12 = vector.extract_strided_slice %11 {offsets = [0, 0], sizes = [4, 256], strides = [1, 1]} : vector<8x256xf32> to vector<4x256xf32>
    %13 = vector.extract_strided_slice %9 {offsets = [0, 0], sizes = [4, 256], strides = [1, 1]} : vector<8x256xf32> to vector<4x256xf32>
    %14 = arith.subf %12, %13 : vector<4x256xf32>
    %c0_8 = arith.constant 0 : index
    %c0_9 = arith.constant 0 : index
    %15 = vector.load %arg5[%c0_8, %c0_9] : memref<8x256xf32, #tpu.memory_space<vmem>>, vector<4x256xf32>
    %16 = arith.mulf %14, %14 : vector<4x256xf32>
    %17 = arith.addf %15, %16 : vector<4x256xf32>
    %c0_10 = arith.constant 0 : index
    %c0_11 = arith.constant 0 : index
    %18 = vector.load %arg5[%c0_10, %c0_11] : memref<8x256xf32, #tpu.memory_space<vmem>>, vector<4x256xf32>
    tpu.vector_store %arg5[%c0_10, %c0_11], %17 {strides = array<i32>} : memref<8x256xf32, #tpu.memory_space<vmem>>, vector<4x256xf32>,
    %19 = vector.extract_strided_slice %9 {offsets = [4, 0], sizes = [1, 256], strides = [1, 1]} : vector<8x256xf32> to vector<1x256xf32>
    %20 = vector.extract_strided_slice %11 {offsets = [4, 0], sizes = [1, 256], strides = [1, 1]} : vector<8x256xf32> to vector<1x256xf32>
    %cst = arith.constant 1.000000e+00 : f32
    %21 = vector.broadcast %cst : f32 to vector<1x256xf32>
    %22 = arith.cmpf oeq, %20, %21 : vector<1x256xf32>
    %23 = arith.extui %22 : vector<1x256xi1> to vector<1x256xi32>
    %24 = arith.sitofp %23 : vector<1x256xi32> to vector<1x256xf32>
    %cst_12 = arith.constant 0.000000e+00 : f32
    %25 = vector.broadcast %cst_12 : f32 to vector<1x256xf32>
    %26 = arith.cmpf oeq, %20, %25 : vector<1x256xf32>
    %27 = arith.extui %26 : vector<1x256xi1> to vector<1x256xi32>
    %28 = arith.sitofp %27 : vector<1x256xi32> to vector<1x256xf32>
    %cst_13 = arith.constant 0.000000e+00 : f32
    %29 = vector.broadcast %cst_13 : f32 to vector<1x256xf32>
    %30 = arith.maximumf %19, %29 : vector<1x256xf32>
    %31 = arith.mulf %19, %20 : vector<1x256xf32>
    %32 = arith.subf %30, %31 : vector<1x256xf32>
    %33 = math.absf %19 : vector<1x256xf32>
    %cst_14 = arith.constant 0.000000e+00 : f32
    %34 = vector.broadcast %cst_14 : f32 to vector<1x256xf32>
    %35 = arith.subf %34, %33 : vector<1x256xf32>
    %36 = math.exp %35 : vector<1x256xf32>
    %37 = math.log1p %36 : vector<1x256xf32>
    %38 = arith.addf %32, %37 : vector<1x256xf32>
    %c4 = arith.constant 4 : index
    %c0_15 = arith.constant 0 : index
    %39 = vector.load %arg5[%c4, %c0_15] : memref<8x256xf32, #tpu.memory_space<vmem>>, vector<1x256xf32>
    %40 = arith.mulf %38, %24 : vector<1x256xf32>
    %41 = arith.addf %39, %40 : vector<1x256xf32>
    %c4_16 = arith.constant 4 : index
    %c0_17 = arith.constant 0 : index
    %42 = vector.load %arg5[%c4_16, %c0_17] : memref<8x256xf32, #tpu.memory_space<vmem>>, vector<1x256xf32>
    tpu.vector_store %arg5[%c4_16, %c0_17], %41 {strides = array<i32>} : memref<8x256xf32, #tpu.memory_space<vmem>>, vector<1x256xf32>,
    %c5 = arith.constant 5 : index
    %c0_18 = arith.constant 0 : index
    %43 = vector.load %arg5[%c5, %c0_18] : memref<8x256xf32, #tpu.memory_space<vmem>>, vector<1x256xf32>
    %44 = arith.addf %43, %24 : vector<1x256xf32>
    %c5_19 = arith.constant 5 : index
    %c0_20 = arith.constant 0 : index
    %45 = vector.load %arg5[%c5_19, %c0_20] : memref<8x256xf32, #tpu.memory_space<vmem>>, vector<1x256xf32>
    tpu.vector_store %arg5[%c5_19, %c0_20], %44 {strides = array<i32>} : memref<8x256xf32, #tpu.memory_space<vmem>>, vector<1x256xf32>,
    %c6 = arith.constant 6 : index
    %c0_21 = arith.constant 0 : index
    %46 = vector.load %arg5[%c6, %c0_21] : memref<8x256xf32, #tpu.memory_space<vmem>>, vector<1x256xf32>
    %47 = arith.mulf %38, %28 : vector<1x256xf32>
    %48 = arith.addf %46, %47 : vector<1x256xf32>
    %c6_22 = arith.constant 6 : index
    %c0_23 = arith.constant 0 : index
    %49 = vector.load %arg5[%c6_22, %c0_23] : memref<8x256xf32, #tpu.memory_space<vmem>>, vector<1x256xf32>
    tpu.vector_store %arg5[%c6_22, %c0_23], %48 {strides = array<i32>} : memref<8x256xf32, #tpu.memory_space<vmem>>, vector<1x256xf32>,
    %c7 = arith.constant 7 : index
    %c0_24 = arith.constant 0 : index
    %50 = vector.load %arg5[%c7, %c0_24] : memref<8x256xf32, #tpu.memory_space<vmem>>, vector<1x256xf32>
    %51 = arith.addf %50, %28 : vector<1x256xf32>
    %c7_25 = arith.constant 7 : index
    %c0_26 = arith.constant 0 : index
    %52 = vector.load %arg5[%c7_25, %c0_26] : memref<8x256xf32, #tpu.memory_space<vmem>>, vector<1x256xf32>
    tpu.vector_store %arg5[%c7_25, %c0_26], %51 {strides = array<i32>} : memref<8x256xf32, #tpu.memory_space<vmem>>, vector<1x256xf32>,
    %53 = arith.extui %5 : i1 to i32
    %c0_i32_27 = arith.constant 0 : i32
    %54 = arith.cmpi ne, %53, %c0_i32_27 : i32
    scf.if %54 {
      %c0_28 = arith.constant 0 : index
      %c0_29 = arith.constant 0 : index
      %55 = vector.load %arg5[%c0_28, %c0_29] : memref<8x256xf32, #tpu.memory_space<vmem>>, vector<8x256xf32>
      %56 = vector.extract_strided_slice %55 {offsets = [0, 0], sizes = [4, 256], strides = [1, 1]} : vector<8x256xf32> to vector<4x256xf32>
      %57 = vector.shape_cast %56 : vector<4x256xf32> to vector<1x4x256xf32>
      %cst_30 = arith.constant dense<0.000000e+00> : vector<1xf32>
      %58 = vector.multi_reduction <add>, %57, %cst_30 [1, 2] : vector<1x4x256xf32> to vector<1xf32>
      %59 = vector.shape_cast %58 : vector<1xf32> to vector<1x1x1xf32>
      %60 = vector.extract %59[0, 0, 0] : f32 from vector<1x1x1xf32>
      %c0_31 = arith.constant 0 : index
      %61 = memref.load %arg4[%c0_31] : memref<5xf32, #tpu.memory_space<smem>>
      memref.store %60, %arg4[%c0_31] : memref<5xf32, #tpu.memory_space<smem>>
      %62 = vector.extract_strided_slice %55 {offsets = [4, 0], sizes = [1, 256], strides = [1, 1]} : vector<8x256xf32> to vector<1x256xf32>
      %63 = vector.shape_cast %62 : vector<1x256xf32> to vector<1x1x256xf32>
      %cst_32 = arith.constant dense<0.000000e+00> : vector<1xf32>
      %64 = vector.multi_reduction <add>, %63, %cst_32 [1, 2] : vector<1x1x256xf32> to vector<1xf32>
      %65 = vector.shape_cast %64 : vector<1xf32> to vector<1x1x1xf32>
      %66 = vector.extract %65[0, 0, 0] : f32 from vector<1x1x1xf32>
      %c1 = arith.constant 1 : index
      %67 = memref.load %arg4[%c1] : memref<5xf32, #tpu.memory_space<smem>>
      memref.store %66, %arg4[%c1] : memref<5xf32, #tpu.memory_space<smem>>
      %68 = vector.extract_strided_slice %55 {offsets = [5, 0], sizes = [1, 256], strides = [1, 1]} : vector<8x256xf32> to vector<1x256xf32>
      %69 = vector.shape_cast %68 : vector<1x256xf32> to vector<1x1x256xf32>
      %cst_33 = arith.constant dense<0.000000e+00> : vector<1xf32>
      %70 = vector.multi_reduction <add>, %69, %cst_33 [1, 2] : vector<1x1x256xf32> to vector<1xf32>
      %71 = vector.shape_cast %70 : vector<1xf32> to vector<1x1x1xf32>
      %72 = vector.extract %71[0, 0, 0] : f32 from vector<1x1x1xf32>
      %c2 = arith.constant 2 : index
      %73 = memref.load %arg4[%c2] : memref<5xf32, #tpu.memory_space<smem>>
      memref.store %72, %arg4[%c2] : memref<5xf32, #tpu.memory_space<smem>>
      %74 = vector.extract_strided_slice %55 {offsets = [6, 0], sizes = [1, 256], strides = [1, 1]} : vector<8x256xf32> to vector<1x256xf32>
      %75 = vector.shape_cast %74 : vector<1x256xf32> to vector<1x1x256xf32>
      %cst_34 = arith.constant dense<0.000000e+00> : vector<1xf32>
      %76 = vector.multi_reduction <add>, %75, %cst_34 [1, 2] : vector<1x1x256xf32> to vector<1xf32>
      %77 = vector.shape_cast %76 : vector<1xf32> to vector<1x1x1xf32>
      %78 = vector.extract %77[0, 0, 0] : f32 from vector<1x1x1xf32>
      %c3 = arith.constant 3 : index
      %79 = memref.load %arg4[%c3] : memref<5xf32, #tpu.memory_space<smem>>
      memref.store %78, %arg4[%c3] : memref<5xf32, #tpu.memory_space<smem>>
      %80 = vector.extract_strided_slice %55 {offsets = [7, 0], sizes = [1, 256], strides = [1, 1]} : vector<8x256xf32> to vector<1x256xf32>
      %81 = vector.shape_cast %80 : vector<1x256xf32> to vector<1x1x256xf32>
      %cst_35 = arith.constant dense<0.000000e+00> : vector<1xf32>
      %82 = vector.multi_reduction <add>, %81, %cst_35 [1, 2] : vector<1x1x256xf32> to vector<1xf32>
      %83 = vector.shape_cast %82 : vector<1xf32> to vector<1x1x1xf32>
      %84 = vector.extract %83[0, 0, 0] : f32 from vector<1x1x1xf32>
      %c4_36 = arith.constant 4 : index
      %85 = memref.load %arg4[%c4_36] : memref<5xf32, #tpu.memory_space<smem>>
      memref.store %84, %arg4[%c4_36] : memref<5xf32, #tpu.memory_space<smem>>
    } else {
    }
    return
  }
  func.func @transform_0(%arg0: i32, %arg1: i32) -> (i32, i32, i32) {
    %c0_i32 = arith.constant 0 : i32
    %c0_i32_0 = arith.constant 0 : i32
    return %arg0, %c0_i32, %arg1 : i32, i32, i32
  }
  func.func @transform_1(%arg0: i32, %arg1: i32) -> (i32, i32, i32) {
    %c0_i32 = arith.constant 0 : i32
    %c0_i32_0 = arith.constant 0 : i32
    return %arg0, %c0_i32, %arg1 : i32, i32, i32
  }
  func.func @transform_2(%arg0: i32, %arg1: i32) -> i32 {
    %c0_i32 = arith.constant 0 : i32
    %c0_i32_0 = arith.constant 0 : i32
    return %c0_i32 : i32
  }
}

</mosaic_0001>

<bundles_post_ra>
// kernel: tpu_custom_call.1
= control target key start
LH: loop header
LB: loop body
LE: loop exit
PB: predicated region body
PF: predicated region fallthrough
CT: control target
= control target key end

     0   :  { %7 = vsyncpa [#allocation4], 0  ;;  %s915_s0 = inlined_call_operand.hbm [shape: f32[2,8,256], index: 0, kind: input, shape index: {}]   ;;  %s916_s1 = inlined_call_operand.hbm [shape: f32[2,8,256], index: 1, kind: input, shape index: {}]   ;;  %s917_s2 = inlined_call_operand.hbm [shape: f32[5], index: 2, kind: output, shape index: {}]  }
   0x1   :  { %9 = vsyncpa [#allocation4 + $0x1], 0 }
   0x2   :  { %10 = vsyncpa [#allocation7], 0 }
   0x3   :  { %12 = vsyncpa [#allocation7 + $0x1], 0 }
   0x4   :  { %13 = vsyncpa [#allocation5], 0  ;;  %s794_s9 = smov 0   ;;  %s796_s10 = smov 0  }
   0x5   :  { %s798_s11 = smov 0   ;;  %s800_s12 = smov 0  }
   0x6   :  { %s802_s13 = smov 0   ;;  %s804_s14 = smov 0  }
   0x7 LB: > { %s529_s15 = sadd.s32 4294967295, %s774_s14   ;;  %s31_s16 = sadd.s32 1, %s770_s13  ;;  %s774_s14 = sphi %s804_s14, %s19_s14   ;;  %s770_s13 = sphi %s802_s13, %s926_s13   ;;  %s766_s12 = sphi %s800_s12, %s925_s12   ;;  %s762_s11 = sphi %s798_s11, %s924_s11   ;;  %s758_s10 = sphi %s796_s10, %s923_s10   ;;  %s754_s9 = sphi %s794_s9, %s922_s9  }
   0x8   : > { %p33_p0 = scmp.ge.s32.totalorder %s31_s16, 2  ;;  %s40_s17 = sadd.s32 1, %s762_s11 }
   0x9   : > { %p47_p1 = scmp.ne.s32.totalorder %s762_s11, %s758_s10  ;;  %p48_p2 = scmp.eq.s32.totalorder %s774_s14, 0 }
   0xa   : > { %s928_s16 = smov (%p33_p0, %s31_s16), 0  ;;  %p53_p4 = scmp.ne.s32.totalorder %s758_s10, %s754_s9 }
   0xb   : > { %p830_p3 = por %p48_p2, %p47_p1  ;;  %s35_s19 = ssub.s32 %s770_s13, %s928_s16 }
   0xc   : > { %p54_p5 = scmp.eq.s32.totalorder %s529_s15, 0  ;;  %p38_p6 = scmp.eq.s32.totalorder %s35_s19, 0 }
   0xd   : > { %p580_p8 = scmp.lt.s32.totalorder %s774_s14, 2  ;;  %s126_s22 = sand.u32 1, %s762_s11  }
   0xe   : > { %p839_p7 = por %p54_p5, %p53_p4  ;;  %s551_s23 = sshll.u32 %s770_s13, 4 }
   0xf   : > { %s845_s21 = scalar_select %p38_p6, %s762_s11, %s40_s17  }
  0x10   : > { %s532_s24 = sshll.u32 %s126_s22, 4  ;;  %s137_s27 = scalar_lea.hbm %s915_s0, %s551_s23 }
  0x11   : > { %s139_s28 = sshll.u32 %s137_s27, 4  ;;  %s130_s29 = scalar_lea.vmem [#allocation3], %s532_s24  ;;  %s140_s28 = int_to_ptr.hbm [resolvable:$true] %s139_s28 }
  0x12   : > { %s141_s30 = sshll.u32 %s130_s29, 4  ;;  %p574_p9 = pnand %p580_p8, %p830_p3  ;;  %s142_s30 = int_to_ptr.vmem [resolvable:$true] %s141_s30 }
  0x13   : > { %p538_p10 = scmp.ge.s32.totalorder %s774_s14, 1  ;;  %p168_p11 = scmp.lt.s32.totalorder %s774_s14, 3 }
  0x14   : > { %s127_s3 = scalar_lea.sflag [#allocation4], %s126_s22  ;;  %s159_s6 = scalar_lea.hbm %s916_s1, %s551_s23 }
  0x15   : > { %576 = dma.hbm_to_vmem [thread:$0]  (!%p574_p9), %s140_s28, 256, %s142_s30, %s127_s3  }
  0x16   : > { %p169_p12 = pnand %p538_p10, %p168_p11  ;;  %s161_s7 = sshll.u32 %s159_s6, 4  ;;  %s162_s7 = int_to_ptr.hbm [resolvable:$true] %s161_s7 }
  0x17   : > { %s152_s8 = scalar_lea.vmem [#allocation6], %s532_s24  ;;  %s149_s17 = scalar_lea.sflag [#allocation7], %s126_s22 }
  0x18   : > { %s163_s9 = sshll.u32 %s152_s8, 4  ;;  %172 = sbr.rel (%p169_p12) target bundleno = 314 (0x13a), region = 28  ;;  %s164_s9 = int_to_ptr.vmem [resolvable:$true] %s163_s9 }
  0x19   : > { %579 = dma.hbm_to_vmem [thread:$0]  (!%p574_p9), %s162_s7, 256, %s164_s9, %s149_s17  }
  0x1a   : > { %s174_s18 = sand.u32 (!%p169_p12), 1, %s758_s10  }
  0x1b   : > { %s539_s19 = sshll.u32 (!%p169_p12), %s174_s18, 4  ;;  %s175_s25 = scalar_lea.sflag (!%p169_p12), [#allocation4], %s174_s18 }
  0x1c   : > { %s178_s26 = scalar_lea.vmem (!%p169_p12), [#allocation3], %s539_s19 }
  0x1d   : > { %741 = dma.done.wait (%p839_p7), %s175_s25, 256  }
  0x1e   : > { %743 = vsyncadd (%p839_p7), %s175_s25, 4294967040  ;;  %s185_s23 = scalar_lea.sflag [#allocation7], %s174_s18  ;;  %s188_s24 = scalar_lea.vmem [#allocation6], %s539_s19 }
  0x1f   : > { %745 = dma.done.wait (%p839_p7), %s185_s23, 256  }
  0x20   : > { %747 = vsyncadd (%p839_p7), %s185_s23, 4294967040  ;;  %p212_p13 = scmp.eq.s32.totalorder %s766_s12, 0  ;;  %p216_p0 = scmp.eq.s32.totalorder %s766_s12, 1 }
  0x21   : > { %v776_v0 = vmov (%p212_p13), 0.0  }
  0x22   : > { %220 = sbr.rel (!%p212_p13) target bundleno = 39 (0x27), region = 40  ;;  %221 = vst [vmem:[#allocation2] sm:$0xff] (%p212_p13), %v776_v0 }
  0x23   : > { %222 = vst [vmem:[#allocation2 + $0x8] sm:$0xff] (%p212_p13), %v776_v0 }
  0x27 PF: > { %v223_v1 = vld [vmem:[%s178_s26] sm:$0xff]  ;;  %v224_v2 = vld [vmem:[%s178_s26 + $0x8] sm:$0xff]  ;;  %v777_v32 = vmov 0.0   ;;  %v295_v50 = vlaneseq  ;;  %vm343_vm7 = vcmask (%p216_p0), 1043456   ;;  %vm364_vm8 = vcmask (%p216_p0), 1040384  }
  0x28   : > { %v255_v3 = vand.u32 2147483647, %v223_v1  ;;  %v256_v5 = vand.u32 2147483647, %v224_v2  ;;  %v225_v13 = vld [vmem:[%s188_s24] sm:$0xff]  ;;  %v226_v16 = vld [vmem:[%s188_s24 + $0x8] sm:$0xff] }
  0x29   : > { %v249_v18 = vmax.f32 %v223_v1, 0.0  ;;  %v251_v19 = vmul.f32 %v225_v13, %v223_v1  ;;  %v250_v22 = vmax.f32 %v224_v2, 0.0  ;;  %v252_v23 = vmul.f32 %v226_v16, %v224_v2  ;;  %v229_v42 = vld [vmem:[#allocation2] sm:$0xf] }
  0x2a   : > { %v257_v4 = vsub.f32 0.0, %v255_v3  ;;  %v258_v7 = vsub.f32 0.0, %v256_v5  ;;  %vm237_vm0 = vcmp.eq.f32.partialorder %v225_v13, 1.0  ;;  %vm238_vm2 = vcmp.eq.f32.partialorder %v226_v16, 1.0  ;;  %v230_v46 = vld [vmem:[#allocation2 + $0x8] sm:$0xf] }
  0x2b   : > { %v253_v27 = vsub.f32 %v249_v18, %v251_v19  ;;  %v254_v31 = vsub.f32 %v250_v22, %v252_v23  ;;  %v543_v33 = vsel %vm237_vm0, 1.0, %v777_v32  ;;  %v544_v37 = vsel %vm238_vm2, 1.0, %v777_v32  ;;  %v284_v51 = vld [vmem:[#allocation2 + $0x4] ss:$8 sm:$0x3] }
  0x2c   : > { %v259_v6 = vmul.f32 1.442695, %v257_v4  ;;  %v261_v8 = vmul.f32 1.442695, %v258_v7  ;;  %v227_v41 = vsub.f32 %v225_v13, %v223_v1  ;;  %v228_v43 = vsub.f32 %v226_v16, %v224_v2 }
  0x2d   : > { %vm243_vm4 = vcmp.eq.f32.partialorder %v225_v13, 0.0  ;;  %vm870_vm5 = vcmp.lt.s32.totalorder %v295_v50, 256  ;;  %vm244_vm6 = vcmp.eq.f32.partialorder %v226_v16, 0.0  ;;  %v302_v59 = vld [vmem:[#allocation2 + $0x5] ss:$8 sm:$0x3] }
  0x2e   : > { %634 = vpow2.f32 %v259_v6  ;;  %v231_v45 = vmul.f32 %v227_v41, %v227_v41  ;;  %v232_v47 = vmul.f32 %v228_v43, %v228_v43  ;;  %v545_v55 = vsel %vm243_vm4, 1.0, %v777_v32  ;;  %v314_v62 = vld [vmem:[#allocation2 + $0x6] ss:$8 sm:$0x3] }
  0x2f   : > { %636 = vpow2.f32 %v261_v8  ;;  %v546_v56 = vsel %vm244_vm6, 1.0, %v777_v32  ;;  %v328_v1 = vld [vmem:[#allocation2 + $0x7] ss:$8 sm:$0x3] }
  0x30   : > { %v233_v48 = vadd.f32 %v231_v45, %v229_v42  ;;  %v234_v49 = vadd.f32 %v232_v47, %v230_v46 }
  0x32   : > { %235 = vst [vmem:[#allocation2] sm:$0xf] %v233_v48 }
  0x33   : > { %236 = vst [vmem:[#allocation2 + $0x8] sm:$0xf] %v234_v49 }
  0x34   : > { %v635_v9 = vpop.eup %634 }
  0x35   : > { %v263_v10 = vadd.f32 1.0, %v635_v9  ;;  %v266_v11 = vmul.f32 -0.5, %v635_v9  ;;  %v637_v12 = vpop.eup %636  ;;  %v269_v20 = vand.u32 2147483647, %v635_v9 }
  0x36   : > { %v272_v14 = vadd.f32 1.0, %v637_v12  ;;  %v275_v17 = vmul.f32 -0.5, %v637_v12  ;;  %v278_v24 = vand.u32 2147483647, %v637_v12 }
  0x37   : > { %638 = vlog2.f32 %v263_v10  ;;  %v267_v15 = vadd.f32 1.0, %v266_v11  ;;  %vm270_vm1 = vcmp.lt.f32.partialorder %v269_v20, 0.0004427343 }
  0x38   : > { %640 = vlog2.f32 %v272_v14  ;;  %v276_v21 = vadd.f32 1.0, %v275_v17  ;;  %vm279_vm3 = vcmp.lt.f32.partialorder %v278_v24, 0.0004427343 }
  0x39   : > { %v268_v25 = vmul.f32 %v635_v9, %v267_v15 }
  0x3a   : > { %v277_v29 = vmul.f32 %v637_v12, %v276_v21 }
  0x3d   : > { %v639_v26 = vpop.eup %638 }
  0x3e   : > { %v265_v28 = vmul.f32 0.6931472, %v639_v26  ;;  %v641_v30 = vpop.eup %640 }
  0x3f   : > { %v274_v35 = vmul.f32 0.6931472, %v641_v30 }
  0x40   : > { %v271_v34 = vsel %vm270_vm1, %v268_v25, %v265_v28 }
  0x41   : > { %v281_v36 = vadd.f32 %v271_v34, %v253_v27  ;;  %v280_v38 = vsel %vm279_vm3, %v277_v29, %v274_v35 }
  0x42   : > { %v282_v40 = vadd.f32 %v280_v38, %v254_v31 }
  0x43   : > { %v285_v39 = vmul.f32 %v543_v33, %v281_v36  ;;  %v315_v57 = vmul.f32 %v545_v55, %v281_v36 }
  0x44   : > { %v286_v44 = vmul.f32 %v544_v37, %v282_v40  ;;  %v316_v58 = vmul.f32 %v546_v56, %v282_v40 }
  0x45   : > { %289 = vst [vmem:[#allocation1] sm:$0xff] %v285_v39 }
  0x46   : > { %290 = vst [vmem:[#allocation1 + $0x9] sm:$0xff] %v286_v44 }
  0x4d   : > { %v292_v52 = vld [vmem:[#allocation1 + $0x4] ss:$9 sm:$0xff] }
  0x4e   : > { %305 = vst [vmem:[#allocation1] sm:$0xff] %v543_v33  ;;  %v294_v54 = vadd.f32 %v292_v52, %v284_v51 }
  0x4f   : > { %306 = vst [vmem:[#allocation1 + $0x9] sm:$0xff] %v544_v37 }
  0x50   : > { %299 = vst.msk [vmem:[#allocation2 + $0x4] ss:$8 sm:$0x3] %vm870_vm5, %v294_v54 }
  0x56   : > { %v308_v60 = vld [vmem:[#allocation1 + $0x4] ss:$9 sm:$0xff] }
  0x57   : > { %319 = vst [vmem:[#allocation1] sm:$0xff] %v315_v57  ;;  %v310_v61 = vadd.f32 %v308_v60, %v302_v59 }
  0x58   : > { %320 = vst [vmem:[#allocation1 + $0x9] sm:$0xff] %v316_v58 }
  0x59   : > { %311 = vst.msk [vmem:[#allocation2 + $0x5] ss:$8 sm:$0x3] %vm870_vm5, %v310_v61 }
  0x5f   : > { %v322_v63 = vld [vmem:[#allocation1 + $0x4] ss:$9 sm:$0xff] }
  0x60   : > { %331 = vst [vmem:[#allocation1] sm:$0xff] %v545_v55  ;;  %v324_v0 = vadd.f32 %v322_v63, %v314_v62 }
  0x61   : > { %332 = vst [vmem:[#allocation1 + $0x9] sm:$0xff] %v546_v56 }
  0x62   : > { %325 = vst.msk [vmem:[#allocation2 + $0x6] ss:$8 sm:$0x3] %vm870_vm5, %v324_v0 }
  0x67   : > { %340 = sbr.rel (!%p216_p0) target bundleno = 308 (0x134), region = 44 }
  0x68   : > { %v334_v2 = vld [vmem:[#allocation1 + $0x4] ss:$9 sm:$0xff] }
  0x69   : > { %v336_v3 = vadd.f32 %v334_v2, %v328_v1 }
  0x6b   : > { %337 = vst.msk [vmem:[#allocation2 + $0x7] ss:$8 sm:$0x3] %vm870_vm5, %v336_v3 }
  0x72   : > { %v341_v4 = vld [vmem:[#allocation2] sm:$0xff]  ;;  %v342_v5 = vld [vmem:[#allocation2 + $0x8] sm:$0xff] }
  0x73   : > { %v344_v6 = vsel %vm343_vm7, %v341_v4, 0.0  ;;  %v345_v7 = vsel %vm343_vm7, %v342_v5, 0.0  ;;  %v379_v8 = vrot.slane %v341_v4, 5  ;;  %v380_v9 = vrot.slane %v342_v5, 5 }
  0x74   : > { %v346_v10 = vadd.f32 %v345_v7, %v344_v6  ;;  %v415_v11 = vrot.slane %v341_v4, 7  ;;  %v416_v12 = vrot.slane %v342_v5, 7  ;;  %v360_v13 = vrot.slane %v341_v4, 4 }
  0x75   : > { %v383_v14 = vsel %vm364_vm8, %v379_v8, 0.0  ;;  %v384_v15 = vsel %vm364_vm8, %v380_v9, 0.0  ;;  %v361_v16 = vrot.slane %v342_v5, 4  ;;  %v397_v17 = vrot.slane %v341_v4, 6 }
  0x76   : > { %347 = vadd.xlane.f32.xlu0 %v346_v10  ;;  %v385_v18 = vadd.f32 %v384_v15, %v383_v14  ;;  %v419_v19 = vsel %vm364_vm8, %v415_v11, 0.0  ;;  %v420_v20 = vsel %vm364_vm8, %v416_v12, 0.0  ;;  %v365_v22 = vsel %vm364_vm8, %v360_v13, 0.0 }
  0x77   : > { %v421_v21 = vadd.f32 %v420_v20, %v419_v19  ;;  %v366_v23 = vsel %vm364_vm8, %v361_v16, 0.0  ;;  %v398_v24 = vrot.slane %v342_v5, 6  ;;  %v401_v25 = vsel %vm364_vm8, %v397_v17, 0.0 }
  0x78   : > { %386 = vadd.xlane.f32.xlu1 %v385_v18  ;;  %v367_v27 = vadd.f32 %v366_v23, %v365_v22 }
  0x79   : > { %422 = vadd.xlane.f32.xlu2 %v421_v21  ;;  %v402_v26 = vsel %vm364_vm8, %v398_v24, 0.0 }
  0x7a   : > { %v403_v28 = vadd.f32 %v402_v26, %v401_v25 }
  0x7e   : > { %368 = vadd.xlane.f32.xlu0 %v367_v27 }
  0x80   : > { %404 = vadd.xlane.f32.xlu1 %v403_v28 }
  0xe9   : > { %v348_v29 = vpop.xlane.xlu0 %347 }
  0xea   : > { %v349_v30 = vrot.slane %v348_v29, 4 }
  0xeb   : > { %v387_v31 = vpop.xlane.xlu1 %386 }
  0xec   : > { %v350_v32 = vadd.f32 %v349_v30, %v348_v29  ;;  %v388_v33 = vrot.slane %v387_v31, 4  ;;  %v423_v34 = vpop.xlane.xlu2 %422 }
  0xed   : > { %v424_v35 = vrot.slane %v423_v34, 4 }
  0xee   : > { %v351_v36 = vrot.slane %v350_v32, 2  ;;  %v389_v37 = vadd.f32 %v388_v33, %v387_v31 }
  0xef   : > { %v425_v38 = vadd.f32 %v424_v35, %v423_v34 }
  0xf0   : > { %v352_v39 = vadd.f32 %v351_v36, %v350_v32  ;;  %v390_v40 = vrot.slane %v389_v37, 2 }
  0xf1   : > { %v369_v41 = vpop.xlane.xlu0 %368  ;;  %v426_v44 = vrot.slane %v425_v38, 2 }
  0xf2   : > { %v370_v42 = vrot.slane %v369_v41, 4  ;;  %v353_v43 = vrot.slane %v352_v39, 1  ;;  %v391_v49 = vadd.f32 %v390_v40, %v389_v37 }
  0xf3   : > { %v405_v45 = vpop.xlane.xlu1 %404  ;;  %v427_v52 = vadd.f32 %v426_v44, %v425_v38 }
  0xf4   : > { %v371_v46 = vadd.f32 %v370_v42, %v369_v41  ;;  %v406_v47 = vrot.slane %v405_v45, 4  ;;  %v354_v48 = vadd.f32 %v353_v43, %v352_v39  ;;  %v392_v55 = vrot.slane %v391_v49, 1 }
  0xf5   : > { %v428_v58 = vrot.slane %v427_v52, 1 }
  0xf6   : > { %v372_v50 = vrot.slane %v371_v46, 2  ;;  %v407_v51 = vadd.f32 %v406_v47, %v405_v45  ;;  %555 = vpush %v354_v48  ;;  %v393_v61 = vadd.f32 %v392_v55, %v391_v49 }
  0xf7   : > { %v429_v63 = vadd.f32 %v428_v58, %v427_v52 }
  0xf8   : > { %v373_v53 = vadd.f32 %v372_v50, %v371_v46  ;;  %v408_v54 = vrot.slane %v407_v51, 2 }
  0xfa   : > { %v409_v56 = vadd.f32 %v408_v54, %v407_v51  ;;  %v374_v57 = vrot.slane %v373_v53, 1 }
  0xfc   : > { %v375_v59 = vadd.f32 %v374_v57, %v373_v53  ;;  %v410_v60 = vrot.slane %v409_v56, 1 }
  0xfe   : > { %557 = vpush %v375_v59  ;;  %v411_v62 = vadd.f32 %v410_v60, %v409_v56 }
  0xff   : > { %559 = vpush %v393_v61 }
 0x100   : > { %561 = vpush %v411_v62 }
 0x101   : > { %563 = vpush %v429_v63 }
 0x127   : > { %s556_s12 = spop %555 }
 0x128   : > { %357 = sst [smem:[#allocation8]] %s556_s12 }
 0x12f   : > { %s558_s20 = spop %557 }
 0x130   : > { %378 = sst [smem:[#allocation8 + $0x1]] %s558_s20  ;;  %s560_s22 = spop %559 }
 0x131   : > { %396 = sst [smem:[#allocation8 + $0x2]] %s560_s22  ;;  %s562_s27 = spop %561 }
 0x132   : > { %414 = sst [smem:[#allocation8 + $0x3]] %s562_s27  ;;  %s564_s28 = spop %563 }
 0x133   : > { %432 = sst [smem:[#allocation8 + $0x4]] %s564_s28 }
 0x134 PF: > { %p581_p1 = scmp.eq.s32.totalorder %s529_s15, 1  ;;  %s439_s3 = sshll.u32 %s917_s2, 4  ;;  %s440_s3 = int_to_ptr.hbm [resolvable:$true] %s439_s3 }
 0x135   : > { %s778_s4 = smov [#allocation8]  }
 0x136   : > { %570 = dma.smem_to_hbm (%p581_p1), %s778_s4, 16, %s440_s3, [#allocation5]  }
 0x137   : > { %749 = dma.done.wait (%p581_p1), [#allocation5], 16  }
 0x138   : > { %751 = vsyncadd (%p581_p1), [#allocation5], 4294967280 }
 0x139   : > { %448 = sfence }
 0x13a PF: > { %s19_s14 = sadd.s32 1, %s774_s14   ;;  %s922_s9 = smov %s758_s10 }
 0x13b   : > { %p16_p2 = scmp.ge.s32.totalorder %s19_s14, 4   ;;  %s923_s10 = smov %s762_s11 }
 0x13c   : > { %s924_s11 = smov %s845_s21  ;;  %s925_s12 = smov %s770_s13 }
 0x13d   : > { %s926_s13 = smov %s928_s16  ;;  %18 = sbr.rel (!%p16_p2) target bundleno = 7 (0x7), region = 99 }
 0x142   :  { %454 = vsyncpa [#allocation4], 1 }
 0x143   :  { %456 = vsyncpa [#allocation4 + $0x1], 1 }
 0x144   :  { %457 = vsyncpa [#allocation7], 1 }
 0x145   :  { %459 = vsyncpa [#allocation7 + $0x1], 1 }
 0x146   :  { %460 = vsyncpa [#allocation5], 1 }
 0x147   :  { %462 = vsyncpa [#allocation5 + $0x1], 1 }

</bundles_post_ra>
